<compile_context>
chip_gen: v6e
topology: v6e:2x2x1
jax: 0.10.0
libtpu: 0.0.40
codegen_flags: <defaults>
</compile_context>

<pallas_src>
import jax
import jax.numpy as jnp
from jax.experimental import pallas as pl
from jax.experimental.pallas import tpu as pltpu


def mlp_kernel(x_ref, w1_ref, b1_ref, w2_ref, b2_ref, w3_ref, b3_ref, o_ref):
    # x_ref: (10, tb) with batch on the lane axis; weights are PyTorch (out, in).
    x = x_ref[...]                                                      # (10, tb)
    h = jnp.dot(w1_ref[...], x, preferred_element_type=jnp.float32)    # (8, tb)
    h = jnp.maximum(h + b1_ref[...], 0.0)                              # bias (8,1) bcasts over lanes
    h = jnp.dot(w2_ref[...], h, preferred_element_type=jnp.float32)    # (4, tb)
    h = jnp.maximum(h + b2_ref[...], 0.0)
    h = jnp.dot(w3_ref[...], h, preferred_element_type=jnp.float32)    # (2, tb)
    o_ref[...] = (h + b3_ref[...]).astype(o_ref.dtype)                 # lane-dense store


def mlp_forward(x, params, *, block_b=4096):
    """x: (B, 10) float32 (PyTorch layout). Returns (B, 2) float32."""
    B, F = x.shape
    assert F == 10, F

    # Feature-major view (10, B): batch lands on the 128-wide lane axis.
    # TODO(synk): if the producer can emit x as (10, B) directly, this single
    # transpose pass over x disappears entirely.
    x_t = x.T

    w1, w2, w3 = params["W1"], params["W2"], params["W3"]     # (out, in)
    b1 = params["b1"].reshape(-1, 1)                          # (out, 1)
    b2 = params["b2"].reshape(-1, 1)
    b3 = params["b3"].reshape(-1, 1)

    # Batch tile on the lane axis: either the whole (small) batch as one full
    # block, or a multiple of 128 with a Pallas-masked ragged final block.
    # v6e plateaus around tb=1024-2048; v7x likes 4096-8192 (footprint is only
    # ~tb * (16+8) * 4 B double-buffered, well under the scoped VMEM limit).
    if B <= 128:
        tb = B
    else:
        tb = max(128, (min(block_b, B) // 128) * 128)
    grid_b = pl.cdiv(B, tb)

    out_t = pl.pallas_call(
        mlp_kernel,
        out_shape=jax.ShapeDtypeStruct((2, B), jnp.float32),
        grid=(grid_b,),
        in_specs=[
            pl.BlockSpec((10, tb), lambda i: (0, i)),   # streamed per step
            pl.BlockSpec(w1.shape, lambda i: (0, 0)),   # resident weights/biases
            pl.BlockSpec(b1.shape, lambda i: (0, 0)),
            pl.BlockSpec(w2.shape, lambda i: (0, 0)),
            pl.BlockSpec(b2.shape, lambda i: (0, 0)),
            pl.BlockSpec(w3.shape, lambda i: (0, 0)),
            pl.BlockSpec(b3.shape, lambda i: (0, 0)),
        ],
        out_specs=pl.BlockSpec((2, tb), lambda i: (0, i)),   # lane-dense output
        compiler_params=pltpu.CompilerParams(
            dimension_semantics=("parallel",)                # megacore on v7x
        ),
    )(x_t, w1, b1, w2, b2, w3, b3)

    return out_t.T                                           # back to (B, 2)


def init_params(key):
    """Deterministic params in PyTorch nn.Linear layout: weight (out, in)."""
    k1, k2, k3, k4, k5, k6 = jax.random.split(key, 6)
    s = 0.1
    return {
        "W1": s * jax.random.normal(k1, (8, 10), dtype=jnp.float32),
        "b1": s * jax.random.normal(k2, (8,), dtype=jnp.float32),
        "W2": s * jax.random.normal(k3, (4, 8), dtype=jnp.float32),
        "b2": s * jax.random.normal(k4, (4,), dtype=jnp.float32),
        "W3": s * jax.random.normal(k5, (2, 4), dtype=jnp.float32),
        "b3": s * jax.random.normal(k6, (2,), dtype=jnp.float32),
    }


def reference_forward(x, params):
    """Pure-JAX reference matching the PyTorch forward exactly."""
    h = jnp.maximum(x @ params["W1"].T + params["b1"], 0.0)
    h = jnp.maximum(h @ params["W2"].T + params["b2"], 0.0)
    return h @ params["W3"].T + params["b3"]


if __name__ == "__main__":
    key = jax.random.PRNGKey(0)
    kx, kp = jax.random.split(key)
    params = init_params(kp)

    # Case 1: multi-step grid with a ragged final block (300 = 2*128 + 44),
    # exercising streamed x tiles, resident weights, and masked ragged stores.
    x_big = jax.random.normal(kx, (300, 10), dtype=jnp.float32)
    out_big = jax.block_until_ready(mlp_forward(x_big, params, block_b=128))
    ref_big = reference_forward(x_big, params)
    assert out_big.shape == (300, 2), out_big.shape
    assert jnp.allclose(out_big, ref_big, atol=2e-3, rtol=2e-3), (
        "max abs diff %e" % float(jnp.max(jnp.abs(out_big - ref_big))))

    # Case 2: tiny batch -> single full-array block (tb == B == 50).
    x_small = x_big[:50]
    out_small = jax.block_until_ready(mlp_forward(x_small, params))
    ref_small = reference_forward(x_small, params)
    assert out_small.shape == (50, 2), out_small.shape
    assert jnp.allclose(out_small, ref_small, atol=2e-3, rtol=2e-3), (
        "max abs diff %e" % float(jnp.max(jnp.abs(out_small - ref_small))))

    print("KERNEL_OK")
</pallas_src>

<mosaic_0001>
module attributes {stable_mosaic.version = 11 : i64} {
  func.func @mlp_kernel(%arg0: i32, %arg1: memref<10x128xf32, #tpu.memory_space<vmem>>, %arg2: memref<8x10xf32, #tpu.memory_space<vmem>>, %arg3: memref<8x1xf32, #tpu.memory_space<vmem>>, %arg4: memref<4x8xf32, #tpu.memory_space<vmem>>, %arg5: memref<4x1xf32, #tpu.memory_space<vmem>>, %arg6: memref<2x4xf32, #tpu.memory_space<vmem>>, %arg7: memref<2x1xf32, #tpu.memory_space<vmem>>, %arg8: memref<2x128xf32, #tpu.memory_space<vmem>>) attributes {dimension_semantics = [#tpu.dimension_semantics<parallel>], iteration_bounds = array<i64: 3>, scalar_prefetch = 0 : i64, scratch_operands = 0 : i64, tpu.core_type = #tpu.core_type<tc>, window_params = [{transform_indices = @transform_0, window_bounds = array<i64: 10, 128>}, {pipeline_mode = #tpu.pipeline_mode<synchronous>, transform_indices = @transform_1, window_bounds = array<i64: 8, 10>}, {pipeline_mode = #tpu.pipeline_mode<synchronous>, transform_indices = @transform_2, window_bounds = array<i64: 8, 1>}, {pipeline_mode = #tpu.pipeline_mode<synchronous>, transform_indices = @transform_3, window_bounds = array<i64: 4, 8>}, {pipeline_mode = #tpu.pipeline_mode<synchronous>, transform_indices = @transform_4, window_bounds = array<i64: 4, 1>}, {pipeline_mode = #tpu.pipeline_mode<synchronous>, transform_indices = @transform_5, window_bounds = array<i64: 2, 4>}, {pipeline_mode = #tpu.pipeline_mode<synchronous>, transform_indices = @transform_6, window_bounds = array<i64: 2, 1>}, {transform_indices = @transform_7, window_bounds = array<i64: 2, 128>}]} {
    %c0 = arith.constant 0 : index
    %c0_0 = arith.constant 0 : index
    %0 = vector.load %arg1[%c0, %c0_0] : memref<10x128xf32, #tpu.memory_space<vmem>>, vector<10x128xf32>
    %c0_1 = arith.constant 0 : index
    %c0_2 = arith.constant 0 : index
    %1 = vector.load %arg2[%c0_1, %c0_2] : memref<8x10xf32, #tpu.memory_space<vmem>>, vector<8x10xf32>
    %cst = arith.constant dense<0.000000e+00> : vector<8x128xf32>
    %2 = tpu.matmul %1, %0, %cst {dimension_numbers = #tpu.dot_dimension_numbers<[1], [0], [0], [1], [0, 0, 1, 1], [], []>} : vector<8x10xf32>, vector<10x128xf32>, vector<8x128xf32> -> vector<8x128xf32>
    %c0_3 = arith.constant 0 : index
    %c0_4 = arith.constant 0 : index
    %3 = vector.load %arg3[%c0_3, %c0_4] : memref<8x1xf32, #tpu.memory_space<vmem>>, vector<8x1xf32>
    %4 = vector.broadcast %3 : vector<8x1xf32> to vector<8x128xf32>
    %5 = arith.addf %2, %4 : vector<8x128xf32>
    %cst_5 = arith.constant 0.000000e+00 : f32
    %6 = vector.broadcast %cst_5 : f32 to vector<8x128xf32>
    %7 = arith.maximumf %5, %6 : vector<8x128xf32>
    %c0_6 = arith.constant 0 : index
    %c0_7 = arith.constant 0 : index
    %8 = vector.load %arg4[%c0_6, %c0_7] : memref<4x8xf32, #tpu.memory_space<vmem>>, vector<4x8xf32>
    %cst_8 = arith.constant dense<0.000000e+00> : vector<4x128xf32>
    %9 = tpu.matmul %8, %7, %cst_8 {dimension_numbers = #tpu.dot_dimension_numbers<[1], [0], [0], [1], [0, 0, 1, 1], [], []>} : vector<4x8xf32>, vector<8x128xf32>, vector<4x128xf32> -> vector<4x128xf32>
    %c0_9 = arith.constant 0 : index
    %c0_10 = arith.constant 0 : index
    %10 = vector.load %arg5[%c0_9, %c0_10] : memref<4x1xf32, #tpu.memory_space<vmem>>, vector<4x1xf32>
    %11 = vector.broadcast %10 : vector<4x1xf32> to vector<4x128xf32>
    %12 = arith.addf %9, %11 : vector<4x128xf32>
    %cst_11 = arith.constant 0.000000e+00 : f32
    %13 = vector.broadcast %cst_11 : f32 to vector<4x128xf32>
    %14 = arith.maximumf %12, %13 : vector<4x128xf32>
    %c0_12 = arith.constant 0 : index
    %c0_13 = arith.constant 0 : index
    %15 = vector.load %arg6[%c0_12, %c0_13] : memref<2x4xf32, #tpu.memory_space<vmem>>, vector<2x4xf32>
    %cst_14 = arith.constant dense<0.000000e+00> : vector<2x128xf32>
    %16 = tpu.matmul %15, %14, %cst_14 {dimension_numbers = #tpu.dot_dimension_numbers<[1], [0], [0], [1], [0, 0, 1, 1], [], []>} : vector<2x4xf32>, vector<4x128xf32>, vector<2x128xf32> -> vector<2x128xf32>
    %c0_15 = arith.constant 0 : index
    %c0_16 = arith.constant 0 : index
    %17 = vector.load %arg7[%c0_15, %c0_16] : memref<2x1xf32, #tpu.memory_space<vmem>>, vector<2x1xf32>
    %18 = vector.broadcast %17 : vector<2x1xf32> to vector<2x128xf32>
    %19 = arith.addf %16, %18 : vector<2x128xf32>
    %c0_17 = arith.constant 0 : index
    %c0_18 = arith.constant 0 : index
    %20 = vector.load %arg8[%c0_17, %c0_18] : memref<2x128xf32, #tpu.memory_space<vmem>>, vector<2x128xf32>
    tpu.vector_store %arg8[%c0_17, %c0_18], %19 {strides = array<i32>} : memref<2x128xf32, #tpu.memory_space<vmem>>, vector<2x128xf32>,
    return
  }
  func.func @transform_0(%arg0: i32) -> (i32, i32) {
    %c0_i32 = arith.constant 0 : i32
    %c0_i32_0 = arith.constant 0 : i32
    return %c0_i32, %arg0 : i32, i32
  }
  func.func @transform_1(%arg0: i32) -> (i32, i32) {
    %c0_i32 = arith.constant 0 : i32
    %c0_i32_0 = arith.constant 0 : i32
    %c0_i32_1 = arith.constant 0 : i32
    return %c0_i32, %c0_i32_0 : i32, i32
  }
  func.func @transform_2(%arg0: i32) -> (i32, i32) {
    %c0_i32 = arith.constant 0 : i32
    %c0_i32_0 = arith.constant 0 : i32
    %c0_i32_1 = arith.constant 0 : i32
    return %c0_i32, %c0_i32_0 : i32, i32
  }
  func.func @transform_3(%arg0: i32) -> (i32, i32) {
    %c0_i32 = arith.constant 0 : i32
    %c0_i32_0 = arith.constant 0 : i32
    %c0_i32_1 = arith.constant 0 : i32
    return %c0_i32, %c0_i32_0 : i32, i32
  }
  func.func @transform_4(%arg0: i32) -> (i32, i32) {
    %c0_i32 = arith.constant 0 : i32
    %c0_i32_0 = arith.constant 0 : i32
    %c0_i32_1 = arith.constant 0 : i32
    return %c0_i32, %c0_i32_0 : i32, i32
  }
  func.func @transform_5(%arg0: i32) -> (i32, i32) {
    %c0_i32 = arith.constant 0 : i32
    %c0_i32_0 = arith.constant 0 : i32
    %c0_i32_1 = arith.constant 0 : i32
    return %c0_i32, %c0_i32_0 : i32, i32
  }
  func.func @transform_6(%arg0: i32) -> (i32, i32) {
    %c0_i32 = arith.constant 0 : i32
    %c0_i32_0 = arith.constant 0 : i32
    %c0_i32_1 = arith.constant 0 : i32
    return %c0_i32, %c0_i32_0 : i32, i32
  }
  func.func @transform_7(%arg0: i32) -> (i32, i32) {
    %c0_i32 = arith.constant 0 : i32
    %c0_i32_0 = arith.constant 0 : i32
    return %c0_i32, %arg0 : i32, i32
  }
}

</mosaic_0001>

<bundles_post_ra>
// kernel: tpu_custom_call.1
= control target key start
LH: loop header
LB: loop body
LE: loop exit
PB: predicated region body
PF: predicated region fallthrough
CT: control target
= control target key end

     0   :  { %12 = vsyncpa [#allocation3], 0  ;;  %s1041_s0 = inlined_call_operand.hbm [shape: f32[10,300], index: 0, kind: input, shape index: {}]   ;;  %s1042_s1 = inlined_call_operand.vmem [shape: f32[8,10], index: 1, kind: input, shape index: {}]   ;;  %s1043_s2 = inlined_call_operand.vmem [shape: f32[8,1], index: 2, kind: input, shape index: {}]   ;;  %s1044_s3 = inlined_call_operand.vmem [shape: f32[4,8], index: 3, kind: input, shape index: {}]   ;;  %s1045_s4 = inlined_call_operand.vmem [shape: f32[4,1], index: 4, kind: input, shape index: {}]   ;;  %s1046_s5 = inlined_call_operand.vmem [shape: f32[2,4], index: 5, kind: input, shape index: {}]   ;;  %s1047_s6 = inlined_call_operand.vmem [shape: f32[2,1], index: 6, kind: input, shape index: {}]   ;;  %s1048_s7 = inlined_call_operand.hbm [shape: f32[2,300], index: 7, kind: output, shape index: {}]  }
   0x1   :  { %14 = vsyncpa [#allocation3 + $0x1], 0 }
   0x2   :  { %15 = vsyncpa [#allocation4], 0 }
   0x3   :  { %17 = vsyncpa [#allocation4 + $0x1], 0  ;;  %s873_s24 = smov 0   ;;  %s875_s25 = smov 0  }
   0x4   :  { %s877_s26 = smov 0   ;;  %s879_s27 = smov 0  }
   0x5 LB: > { %s894_s28 = sadd.s32 4294967295, %s823_s27   ;;  %s636_s29 = sadd.s32 4294967294, %s823_s27   ;;  %s823_s27 = sphi %s879_s27, %s1063_s27   ;;  %s819_s26 = sphi %s877_s26, %s1062_s26   ;;  %s815_s25 = sphi %s875_s25, %s1061_s25   ;;  %s811_s24 = sphi %s873_s24, %s1060_s24  }
   0x6   : > { %s898_s30 = sadd.s32 1, %s823_s27   ;;  %s30_s8 = sadd.s32 1, %s819_s26 }
   0x7   : > { %s27_s9 = ssub.s32 %s823_s27, %s898_s30  ;;  %p37_p0 = scmp.ne.s32.totalorder %s819_s26, %s815_s25 }
   0x8   : > { %p28_p1 = scmp.eq.s32.totalorder %s27_s9, 0  ;;  %p38_p2 = scmp.eq.s32.totalorder %s823_s27, 0 }
   0x9   : > { %p43_p3 = scmp.ne.s32.totalorder %s815_s25, %s811_s24  ;;  %p44_p4 = scmp.eq.s32.totalorder %s894_s28, 0 }
   0xa   : > { %s910_s10 = scalar_select %p28_p1, %s819_s26, %s30_s8  }
   0xb   : > { %p912_p5 = por %p38_p2, %p37_p0  ;;  %p916_p6 = por %p44_p4, %p43_p3 }
   0xc   : > { %p193_p7 = scmp.eq.s32.totalorder %s894_s28, 2  ;;  %p199_p8 = scmp.eq.s32.totalorder %s636_s29, 2 }
   0xd   : > { %s1052_s12 = scalar_select %p916_p6, 1, 0 }
   0xe   : > { %p689_p9 = scmp.lt.s32.totalorder %s823_s27, 3  ;;  %p922_p10 = por %p193_p7, %p37_p0 }
   0xf   : > { %p926_p11 = por %p199_p8, %p43_p3  ;;  %s237_s15 = sand.u32 1, %s819_s26  }
  0x10   : > { %s1053_s13 = scalar_select %p922_p10, 1, 0 }
  0x11   : > { %s1054_s14 = scalar_select %p926_p11, 1, 0 }
  0x12   : > { %s640_s16 = sshll.u32 %s823_s27, 7  ;;  %s639_s17 = sshll.u32 %s237_s15, 4 }
  0x13   : > { %s935_s20 = scalar_lea.hbm %s1041_s0, %s640_s16  ;;  %s241_s21 = scalar_lea.vmem [#allocation2], %s639_s17 }
  0x14   : > { %s247_s22 = sshll.u32 %s241_s21, 4  ;;  %p939_p12 = pnand %p689_p9, %p912_p5  ;;  %s943_s22 = int_to_ptr.vmem [resolvable:$true] %s247_s22 }
  0x15   : > { %s946_s29 = scalar_lea.sflag [#allocation3], %s237_s15  ;;  %s731_s8 = scalar_lea.hbm %s935_s20, 256 }
  0x16   : > { %p732_p0 = scmp.ne.s32.totalorder %s935_s20, %s731_s8  ;;  %p733_p1 = pneg %p939_p12 }
  0x17   : > { %s736_s11 = scalar_lea.hbm %s1041_s0, 768  ;;  %p737_p4 = scmp.lt.s32.totalorder %s935_s20, %s1041_s0 }
  0x18   : > { %p734_p2 = pnand %p733_p1, %p732_p0  ;;  %p738_p5 = scmp.lt.s32.totalorder %s736_s11, %s731_s8 }
  0x1a   : > { %p735_p3 = pneg %p734_p2  ;;  %p739_p7 = por %p738_p5, %p737_p4 }
  0x1c   : > { %p740_p8 = pnand %p739_p7, %p735_p3 }
  0x1e   : > { %743 = shalt.err (!%p740_p8)
}
  0x1f   : > { %s744_s15 = scalar_lea.vmem %s943_s22, 256  ;;  %s825_s19 = smov [#allocation2]  }
  0x20   : > { %p745_p9 = scmp.ne.s32.totalorder %s943_s22, %s744_s15  ;;  %s749_s21 = sshll.u32 %s825_s19, 4  ;;  %s750_s21 = int_to_ptr.vmem [resolvable:$false] %s749_s21 }
  0x21   : > { %s751_s9 = scalar_lea.vmem %s750_s21, 512  ;;  %p752_p2 = scmp.lt.s32.totalorder %s943_s22, %s750_s21 }
  0x22   : > { %p747_p13 = pnand %p745_p9, %p733_p1  ;;  %p753_p11 = scmp.lt.s32.totalorder %s751_s9, %s744_s15 }
  0x24   : > { %p748_p0 = pneg %p747_p13  ;;  %p754_p10 = por %p753_p11, %p752_p2 }
  0x26   : > { %p755_p6 = pnand %p754_p10, %p748_p0 }
  0x28   : > { %758 = shalt.err (!%p755_p6)
}
  0x29   : > { %s826_s8 = smov 384   ;;  %s827_s16 = smov 128  }
  0x2a   : > { %s828_s11 = smov 8   ;;  %p255_p13 = scmp.lt.s32.totalorder %s823_s27, 4 }
  0x2b   : > { %684 = dma.hbm_to_vmem [thread:$0]  (!%p939_p12), %s935_s20, 256, %s943_s22, %s946_s29, %s826_s8, %s827_s16, %s828_s11  }
  0x2c   : > { %p1056_p1 = scmp.ge.s32.totalorder %s823_s27, 1 }
  0x2e   : > { %p256_p3 = pnand %p1056_p1, %p255_p13 }
  0x2f   : > { %s971_s17 = sand.u32 (!%p256_p3), 1, %s815_s25   ;;  %p1057_p6 = scmp.ne.s32.totalorder (!%p256_p3), %s1052_s12, 0 }
  0x30   : > { %259 = sbr.rel (%p256_p3) target bundleno = 665 (0x299), region = 48  ;;  %s642_s18 = sshll.u32 (!%p256_p3), %s971_s17, 4 }
  0x31   : > { %s262_s15 = scalar_lea.sflag (!%p256_p3), [#allocation3], %s971_s17  ;;  %s265_s19 = scalar_lea.vmem (!%p256_p3), [#allocation2], %s642_s18 }
  0x35   : > { %802 = dma.done.wait (%p1057_p6), %s262_s15, 256  }
  0x36   : > { %804 = vsyncadd (%p1057_p6), %s262_s15, 4294967040  ;;  %v829_v0 = vmov 0.0   ;;  %vm830_vm0 = vmmov 0   ;;  %v831_v1 = vmov 0   ;;  %vm309_vm1 = vcmask 1041408   ;;  %v296_v3 = vld [vmem:[%s265_s19] sm:$0xff] }
  0x37   : > { %660 = vmatprep.subr.mxu0 %v829_v0  ;;  %664 = vmatprep.mubr.msk.f32.mxu0 %vm830_vm0, %v829_v0  ;;  %v297_v2 = vld [vmem:[%s265_s19 + $0x8] sm:$0x3]  ;;  %v298_v4 = vld [vmem:[%s1042_s1] sm:$0xff]  ;;  %vm305_vm2 = vcmask 80896   ;;  %vm391_vm3 = vcmask 64512   ;;  %vm477_vm4 = vcmask 1043456  }
  0x38   : > { %729 = vset.pattern.permute.xlu0 %v831_v1  ;;  %667 = vmatprep.subr.mxu1 %v829_v0  ;;  %v299_v5 = vld [vmem:[%s1043_s2] sm:$0xff]  ;;  %vm473_vm5 = vcmask 31744   ;;  %s643_s19 = sshll.u32 %s971_s17, 1  ;;  %s650_s20 = sshll.u32 %s894_s28, 5 }
  0x39   : > { %669 = vmatprep.mubr.msk.f32.mxu1 %vm830_vm0, %v829_v0  ;;  %730 = vset.pattern.permute.xlu1 %v831_v1  ;;  %v385_v6 = vld [vmem:[%s1045_s4] sm:$0xf]  ;;  %s295_s22 = scalar_lea.vmem [#allocation5], %s643_s19  ;;  %s1005_s21 = scalar_lea.hbm %s1048_s7, %s650_s20 }
  0x3a   : > { %661 = vmatpush3.msk.msra.mxu0 %vm309_vm1, %v297_v2  ;;  %302 = vperm.xlu0 %729, %v299_v5   ;;  %v384_v12 = vld [vmem:[%s1044_s3] sm:$0xf]  ;;  %s566_s12 = sshll.u32 %s295_s22, 4  ;;  %s553_s9 = scalar_lea.sflag [#allocation4], %s971_s17  ;;  %s567_s12 = int_to_ptr.vmem [resolvable:$true] %s566_s12 }
  0x3b   : > { %662 = vmatprep.subr.mxu0 %v829_v0  ;;  %v467_v13 = vld [vmem:[%s1047_s6] sm:$0x3]  ;;  %s759_s8 = scalar_lea.vmem %s567_s12, 32  ;;  %p1058_p11 = scmp.ne.s32.totalorder %s1053_s13, 0 }
  0x3c   : > { %663 = vmatpush3.msra.mxu0 %v296_v3  ;;  %470 = vperm.xlu1 %730, %v467_v13   ;;  %v466_v19 = vld [vmem:[%s1046_s5] sm:$0x3]  ;;  %p760_p10 = scmp.ne.s32.totalorder %s567_s12, %s759_s8  ;;  %s832_s16 = smov [#allocation5]  }
  0x3d   : > { %665 = vmatmul.mubr.msk.f32.vlgmr.msra.gmra.mxu0 %vm305_vm2, %v298_v4  ;;  %s763_s28 = sshll.u32 %s832_s16, 4  ;;  %s764_s28 = int_to_ptr.vmem [resolvable:$false] %s763_s28 }
  0x3e   : > { %388 = vperm.xlu0 %729, %v385_v6   ;;  %p761_p12 = pnand %p760_p10, %p1058_p11  ;;  %s765_s11 = scalar_lea.vmem %s764_s28, 64 }
  0x3f   : > { %p766_p5 = scmp.lt.s32.totalorder %s567_s12, %s764_s28  ;;  %p767_p7 = scmp.lt.s32.totalorder %s765_s11, %s759_s8 }
  0x40   : > { %p762_p4 = pneg %p761_p12 }
  0x41   : > { %p768_p8 = por %p767_p7, %p766_p5 }
  0x43   : > { %p769_p9 = pnand %p768_p8, %p762_p4 }
  0xb5   : > { %v303_v7 = vpop.permute.xlu0 %302 }
  0xb7   : > { %v471_v20 = vpop.permute.xlu1 %470 }
  0xb9   : > { %v389_v14 = vpop.permute.xlu0 %388 }
  0xfd   : > { %v379_v8 = vpop.f32.mrf.mxu0 }
  0xfe   : > { %v380_v9 = vadd.f32 %v379_v8, %v303_v7 }
  0xff   : > { %v666_v10 = vpop.f32.mrf.mxu0 }
 0x100   : > { %v383_v11 = vmax.f32 %v380_v9, 0.0 }
 0x102   : > { %668 = vmatpush3.msra.mxu1 %v383_v11 }
 0x103   : > { %670 = vmatmul.mubr.msk.f32.vlgmr.msra.gmra.mxu1 %vm391_vm3, %v384_v12  ;;  %672 = vmatprep.subr.mxu1 %v829_v0 }
 0x104   : > { %674 = vmatprep.mubr.msk.f32.mxu1 %vm830_vm0, %v829_v0 }
 0x1c3   : > { %v461_v15 = vpop.f32.mrf.mxu1 }
 0x1c4   : > { %v462_v16 = vadd.f32 %v461_v15, %v389_v14 }
 0x1c5   : > { %v671_v17 = vpop.f32.mrf.mxu1 }
 0x1c6   : > { %v465_v18 = vmax.f32 %v462_v16, 0.0 }
 0x1c8   : > { %673 = vmatpush3.msk.msra.mxu1 %vm477_vm4, %v465_v18 }
 0x1c9   : > { %675 = vmatmul.mubr.msk.f32.vlgmr.msra.gmra.mxu1 %vm473_vm5, %v466_v19 }
 0x289   : > { %v547_v21 = vpop.f32.mrf.mxu1 }
 0x28a   : > { %v548_v22 = vadd.f32 %v547_v21, %v471_v20 }
 0x28b   : > { %v676_v23 = vpop.f32.mrf.mxu1 }
 0x28c   : > { %551 = vst [vmem:[%s295_s22] sm:$0x3] %v548_v22 }
 0x28d   : > { %772 = shalt.err (!%p769_p9)
}
 0x28e   : > { %s773_s18 = scalar_lea.hbm %s1005_s21, 32  ;;  %s777_s19 = scalar_lea.hbm %s1048_s7, 96 }
 0x28f   : > { %p774_p0 = scmp.ne.s32.totalorder %s1005_s21, %s773_s18  ;;  %p778_p1 = scmp.lt.s32.totalorder %s1005_s21, %s1048_s7 }
 0x290   : > { %p779_p3 = scmp.lt.s32.totalorder %s777_s19, %s773_s18 }
 0x291   : > { %p775_p2 = pnand %p774_p0, %p1058_p11 }
 0x292   : > { %p780_p6 = por %p779_p3, %p778_p1 }
 0x293   : > { %p776_p13 = pneg %p775_p2 }
 0x295   : > { %p781_p10 = pnand %p780_p6, %p776_p13 }
 0x297   : > { %784 = shalt.err (!%p781_p10)
}
 0x298   : > { %679 = dma.vmem_to_hbm [thread:$0]  (%p1058_p11), %s567_s12, 32, %s1005_s21, %s553_s9  }
 0x299 PF: > { %p690_p12 = scmp.ge.s32.totalorder %s823_s27, 2  ;;  %s578_s23 = sand.u32 1, %s811_s24  }
 0x29a   : > { %p1059_p4 = scmp.ne.s32.totalorder %s1054_s14, 0  ;;  %s579_s29 = scalar_lea.sflag [#allocation4], %s578_s23 }
 0x29c   : > { %p686_p5 = pnand %p690_p12, %p1059_p4 }
 0x29e   : > { %p687_p7 = pneg %p686_p5 }
 0x2a0   : > { %806 = dma.done.wait (%p687_p7), %s579_s29, 32  }
 0x2a1   : > { %808 = vsyncadd (%p687_p7), %s579_s29, 4294967264  ;;  %p20_p8 = scmp.ge.s32.totalorder %s898_s30, 5   ;;  %s1060_s24 = smov %s815_s25 }
 0x2a2   : > { %s1061_s25 = smov %s819_s26  ;;  %s1062_s26 = smov %s910_s10 }
 0x2a3   : > { %s1063_s27 = smov %s898_s30  ;;  %22 = sbr.rel (!%p20_p8) target bundleno = 5 (0x5), region = 93 }
 0x2a8   :  { %584 = vsyncpa [#allocation3], 1 }
 0x2a9   :  { %586 = vsyncpa [#allocation3 + $0x1], 1 }
 0x2aa   :  { %587 = vsyncpa [#allocation4], 1 }
 0x2ab   :  { %589 = vsyncpa [#allocation4 + $0x1], 1 }

</bundles_post_ra>
